<compile_context>
chip_gen: v7x
topology: tpu7x:2x2x1
jax: 0.10.0
libtpu: 0.0.40
codegen_flags: <defaults>
</compile_context>

<pallas_src>
import math

import jax
import jax.numpy as jnp
from jax.experimental import pallas as pl
from jax.experimental.pallas import tpu as pltpu

LANE = 128


def _round_up(x, m):
    return ((x + m - 1) // m) * m


def _cdiv(a, b):
    return -(-a // b)


def _vmem_capacity_bytes():
    try:
        return int(pltpu.get_tpu_info().vmem_capacity_bytes)
    except Exception:
        return 64 << 20            # conservative (v7x-sized) default


# ----------------------------- Pallas kernel --------------------------------

def _wiener_kernel(yr_ref, yi_ref, br_ref, bi_ref, as_ref, xr_ref, xi_ref):
    """Per (d-group, plane-tile, image) Wiener combine.

    yr/yi : (C, T)       real/imag of the image FFT tile
    br/bi : (1, T)       real/imag of the blur OTF tile (VMEM resident over b)
    a_s   : (Db, Ca, T)  exp(alpha) * sum_f |G_f|^2   (Ca in {1, C})
    xr/xi : (Db, C, T)   real/imag of conj(B) * Y / (|B|^2 + a_s)
    """
    yr = yr_ref[...]
    yi = yi_ref[...]
    br = br_ref[...]
    bi = bi_ref[...]

    bsq = br * br + bi * bi                        # (1, T)   |B|^2
    nr = br * yr + bi * yi                         # (C, T)   Re(conj(B) * Y)
    ni = br * yi - bi * yr                         # (C, T)   Im(conj(B) * Y)

    out_dtype = xr_ref.dtype
    # Static unroll over the Wiener filters held in this block: only one
    # (Ca, T) `inv` is live at a time and stores interleave with the divides.
    for d in range(xr_ref.shape[0]):
        inv = 1.0 / (bsq + as_ref[d])              # exact divide (VALU slack is free)
        xr_ref[d] = (nr * inv).astype(out_dtype)
        xi_ref[d] = (ni * inv).astype(out_dtype)


def wiener_apply(yr, yi, br, bi, a_s, tile, vmem_limit, out_dtype=jnp.float32):
    """yr/yi: (B, C, Pp); br/bi: (1, Pp); a_s: (D, Ca, Pp); Pp % tile == 0.

    Returns Xr, Xi of shape (B, D, C, Pp) with dtype `out_dtype`."""
    Bn, C, Pp = yr.shape
    D, Ca, _ = a_s.shape
    n_tiles = Pp // tile

    # Degenerate tiny workloads (single tile, single image): split D across an
    # outer parallel grid axis so both v7x TensorCores get work.  Otherwise
    # keep the whole D inside the block so Y is read once per image.
    split_d = (n_tiles == 1 and Bn == 1 and D > 1)
    Dg, Db = (D, 1) if split_d else (1, D)

    # Grid order: d-group (outermost), plane tiles, batch (innermost) — the
    # blur OTF and a_s keep the same block index over the inner batch axis so
    # Pallas does not re-fetch them.
    grid = (Dg, n_tiles, Bn)
    in_specs = [
        pl.BlockSpec((None, C, tile), lambda d, t, b: (b, 0, t)),        # yr
        pl.BlockSpec((None, C, tile), lambda d, t, b: (b, 0, t)),        # yi
        pl.BlockSpec((1, tile), lambda d, t, b: (0, t)),                 # br
        pl.BlockSpec((1, tile), lambda d, t, b: (0, t)),                 # bi
        pl.BlockSpec((Db, Ca, tile), lambda d, t, b: (d, 0, t)),         # a_s
    ]
    out_specs = (
        pl.BlockSpec((None, Db, C, tile), lambda d, t, b: (b, d, 0, t)),  # Xr
        pl.BlockSpec((None, Db, C, tile), lambda d, t, b: (b, d, 0, t)),  # Xi
    )
    return pl.pallas_call(
        _wiener_kernel,
        out_shape=(jax.ShapeDtypeStruct((Bn, D, C, Pp), out_dtype),
                   jax.ShapeDtypeStruct((Bn, D, C, Pp), out_dtype)),
        grid=grid,
        in_specs=in_specs,
        out_specs=out_specs,
        # Default double-buffering; deeper pipelines only burn VMEM here.
        compiler_params=pltpu.CompilerParams(
            dimension_semantics=("parallel", "parallel", "parallel"),
            vmem_limit_bytes=int(vmem_limit)),
    )(yr, yi, br, bi, a_s)


def _plan_plane_tiling(P, C, D, Ca):
    """Pick (tile, padded plane length Pp, vmem_limit_bytes).

    Byte accounting per flattened-plane column:
      * block set (yr, yi, br, bi, a_s, Xr, Xi) — double-buffered by the pipeline,
      * in-kernel intermediates (bsq, nr, ni, one live inv thanks to per-D unroll).
    Generation-aware block budget: ~20 MiB on 128 MiB-VMEM chips (v5e/v6e),
    ~11 MiB on 64 MiB-VMEM chips (v7x)."""
    block_cols = 4 * (2 * C + 2 + D * Ca + 2 * D * C)
    interm_cols = 4 * (1 + 2 * C + Ca)
    per_col = 2 * block_cols + interm_cols

    vmem_phys = _vmem_capacity_bytes()
    block_budget = (20 << 20) if vmem_phys >= (96 << 20) else (11 << 20)

    t_max = max(LANE, (block_budget // block_cols) // LANE * LANE)

    # Pad only to the lane width first, then split into near-equal 128-multiple
    # tiles: worst-case padding is < 128 * n_tiles columns, not a whole tile.
    Pp0 = _round_up(P, LANE)
    n_tiles = _cdiv(Pp0, t_max)
    tile = _round_up(_cdiv(Pp0, n_tiles), LANE)
    Pp = tile * n_tiles

    footprint = per_col * tile
    vmem_limit = max(footprint + (8 << 20), 32 << 20)
    vmem_limit = min(vmem_limit, max(vmem_phys - (8 << 20), 32 << 20))
    return tile, Pp, vmem_limit


# ------------------------------- JAX glue ------------------------------------

def psf2otf(psf, out_hw):
    """Zero-pad psf to out_hw, center it at (0,0), FFT over last two axes."""
    kh, kw = psf.shape[-2], psf.shape[-1]
    Hp, Wp = out_hw
    padded = jnp.zeros(psf.shape[:-2] + (Hp, Wp), psf.dtype)
    padded = padded.at[..., :kh, :kw].set(psf)
    padded = jnp.roll(padded, shift=(-(kh // 2), -(kw // 2)), axis=(-2, -1))
    return jnp.fft.fft2(padded)


def edgetaper(img, psf):
    """MATLAB-style edgetaper: blend image with its circular blur near edges."""
    H, W = img.shape[-2:]

    def beta_1d(proj, n):
        z = jnp.abs(jnp.fft.fft(proj, n - 1)) ** 2
        z = jnp.real(jnp.fft.ifft(z))
        z = jnp.concatenate([z, z[:1]])
        return z / z.max()

    beta_h = beta_1d(psf.sum(axis=1), H)
    beta_w = beta_1d(psf.sum(axis=0), W)
    mask = jnp.outer(1.0 - beta_h, 1.0 - beta_w)          # (H, W)
    otf = psf2otf(psf, (H, W))
    blurred = jnp.real(jnp.fft.ifft2(jnp.fft.fft2(img) * otf))
    return (mask * img + (1.0 - mask) * blurred).astype(img.dtype)


def weight_normalization_5d(w, scale, normalized=True, zero_mean=True):
    """w: (D, F, Cw, kh, kw); scale: (D, F).  Zero-mean + L2-normalize + scale."""
    if zero_mean:
        w = w - jnp.mean(w, axis=(2, 3, 4), keepdims=True)
    if normalized:
        norm = jnp.sqrt(jnp.sum(w * w, axis=(2, 3, 4), keepdims=True))
        w = w / norm
        if scale is not None:
            w = w * scale[:, :, None, None, None]
    return w


def dct2_basis(k):
    """Deterministic 2D DCT-II basis (k*k, k, k) -- stands in for init.dctMultiWiener."""
    n = jnp.arange(k, dtype=jnp.float32)
    f = jnp.arange(k, dtype=jnp.float32)
    b1 = jnp.cos(jnp.pi * (n[None, :] + 0.5) * f[:, None] / k)
    b1 = b1 * jnp.where(f == 0, jnp.sqrt(1.0 / k), jnp.sqrt(2.0 / k))[:, None]
    return jnp.einsum("ia,jb->ijab", b1, b1).reshape(k * k, k, k)


def wiener_deconv_forward(x, blur_kernel, stdn, conv_weights, scale, alpha,
                          pad=True, edge_taper=True, use_pallas=True,
                          lowprec_output=False):
    """Forward pass of WienerDeconvLayer (non-shared Wiener filters).

    x: (B, C, H, W); blur_kernel: (kh, kw); stdn: (B,);
    conv_weights: (D, F, Cw, kh, kw); scale: (D, F); alpha: (D, 1) or (D, C).
    Returns output (B, D, C, H, W) and cstdn (B, D)."""
    B, C, H, W = x.shape
    kh, kw = blur_kernel.shape

    # getPad2RetainShape
    kc_h, kc_w = (kh + 1) // 2, (kw + 1) // 2
    padding = (kc_h - 1, kh - kc_h, kc_w - 1, kw - kc_w)
    if pad:
        x = jnp.pad(x, ((0, 0), (0, 0),
                        (padding[0], padding[1]), (padding[2], padding[3])),
                    mode="symmetric")
    if edge_taper:
        x = edgetaper(x, blur_kernel)
    Hp, Wp = x.shape[-2:]

    w = weight_normalization_5d(conv_weights, scale, True, True)
    D, F, Cw = w.shape[:3]

    # TODO(synk): FFT/IFFT have no Pallas equivalent; jnp.fft is used as glue.
    Y = jnp.fft.fft2(x)                                   # (B, C, Hp, Wp)
    Botf = psf2otf(blur_kernel, (Hp, Wp))                 # (Hp, Wp) -- NOT broadcast
    G = psf2otf(w, (Hp, Wp))                              # (D, F, Cw, Hp, Wp)

    # Batch-independent, tiny regularizer terms (size D*Ca*Hp*Wp): plain jnp
    # off the hot path.
    S = jnp.sum(jnp.real(G) ** 2 + jnp.imag(G) ** 2, axis=1)      # (D, Cw, Hp, Wp)
    alpha_exp = jnp.exp(alpha).astype(jnp.float32)                # (D, 1) or (D, C)
    AS = alpha_exp[:, :, None, None] * S                          # (D, Ca, Hp, Wp)
    Ca = AS.shape[1]

    br2 = jnp.real(Botf).astype(jnp.float32)
    bi2 = jnp.imag(Botf).astype(jnp.float32)
    bsq = br2 * br2 + bi2 * bi2                                   # (Hp, Wp)

    # Noise-amplification factor of each Wiener filter (batch independent).
    cvar = jnp.mean(bsq[None, None] / (bsq[None, None] + AS) ** 2,
                    axis=(-2, -1))                                # (D, Ca)
    cvar = jnp.broadcast_to(cvar, (D, C))                         # tiny
    cstdn = jnp.sqrt((stdn[:, None].astype(jnp.float32) ** 2)
                     * cvar.mean(axis=1)[None, :])                # (B, D)

    if use_pallas:
        P = Hp * Wp
        tile, Pp, vmem_limit = _plan_plane_tiling(P, C, D, Ca)

        def flat_pad(a, value=0.0):
            a = a.reshape(a.shape[:-2] + (P,))
            if Pp > P:
                widths = [(0, 0)] * (a.ndim - 1) + [(0, Pp - P)]
                a = jnp.pad(a, widths, constant_values=value)
            return a

        yr = flat_pad(jnp.real(Y).astype(jnp.float32))            # (B, C, Pp)
        yi = flat_pad(jnp.imag(Y).astype(jnp.float32))
        brf = flat_pad(br2[None], value=1.0)                      # pad keeps denom > 0
        bif = flat_pad(bi2[None])
        asf = flat_pad(AS.astype(jnp.float32))                    # (D, Ca, Pp)

        out_dtype = jnp.bfloat16 if lowprec_output else jnp.float32
        Xr, Xi = wiener_apply(yr, yi, brf, bif, asf, tile, vmem_limit, out_dtype)
        if Pp > P:
            Xr, Xi = Xr[..., :P], Xi[..., :P]
        Xr = Xr.astype(jnp.float32).reshape(B, D, C, Hp, Wp)
        Xi = Xi.astype(jnp.float32).reshape(B, D, C, Hp, Wp)
        X = Xr + 1j * Xi
    else:
        # Pure-jnp reference path (exact divide), identical glue.
        num = jnp.conj(Botf)[None, None, None] * Y[:, None]       # (B, 1, C, Hp, Wp)
        den = bsq[None, None, None] + AS[None]                    # (1, D, Ca, Hp, Wp)
        X = num / den                                             # (B, D, C, Hp, Wp)

    out = jnp.real(jnp.fft.ifft2(X))                              # (B, D, C, Hp, Wp)
    if pad:
        out = out[..., padding[0]:Hp - padding[1], padding[2]:Wp - padding[3]]
    return out.astype(jnp.float32), cstdn


# ---------------------------------- main -------------------------------------

if __name__ == "__main__":
    key = jax.random.PRNGKey(0)
    k_w, k_x = jax.random.split(key)

    # Module hyper-parameters (matching the __init__ defaults / small shapes)
    B, C, H, W = 2, 4, 16, 16
    D, F, ksz = 4, 8, 3                 # numWienerFilters, output_features, kernel_size
    Cw = 1                              # sharedChannels=True
    lb, ub = 1e-4, 1e-2

    # blur kernel (normalized Gaussian, 5x5)
    kb = 5
    ax = jnp.arange(kb, dtype=jnp.float32) - (kb // 2)
    g = jnp.exp(-(ax ** 2) / (2.0 * 1.2 ** 2))
    blur_kernel = jnp.outer(g, g)
    blur_kernel = (blur_kernel / blur_kernel.sum()).astype(jnp.float32)

    # deterministic parameter init (DCT-style filters, like init.dctMultiWiener)
    dct = dct2_basis(ksz)[1:1 + F]                              # (F, ksz, ksz)
    base = jnp.broadcast_to(dct[None, :, None], (D, F, Cw, ksz, ksz))
    conv_weights = (base * (1.0 + 0.05 * jax.random.normal(k_w, base.shape))
                    ).astype(jnp.float32)
    scale = jnp.full((D, F), 0.1, jnp.float32)
    alpha = jnp.log(jnp.logspace(math.log10(lb), math.log10(ub), D)
                    ).reshape(D, 1).astype(jnp.float32)         # sharedAlphaChannels=True

    # example inputs
    x = 0.5 + 0.1 * jax.random.normal(k_x, (B, C, H, W), jnp.float32)
    stdn = jnp.array([0.02, 0.05], jnp.float32)

    out, cstdn = wiener_deconv_forward(x, blur_kernel, stdn,
                                       conv_weights, scale, alpha)
    out, cstdn = jax.block_until_ready((out, cstdn))

    # Pure-jnp reference (exact divide) through the same glue.
    out_ref, cstdn_ref = wiener_deconv_forward(x, blur_kernel, stdn,
                                               conv_weights, scale, alpha,
                                               use_pallas=False)
    out_ref, cstdn_ref = jax.block_until_ready((out_ref, cstdn_ref))

    assert out.shape == (B, D, C, H, W), out.shape
    assert cstdn.shape == (B, D), cstdn.shape
    assert bool(jnp.isfinite(out).all()) and bool(jnp.isfinite(cstdn).all())
    # Exact divide in the kernel -> tight tolerance vs the jnp reference.
    assert bool(jnp.allclose(out, out_ref, rtol=1e-3, atol=1e-3)), \
        float(jnp.max(jnp.abs(out - out_ref)))
    assert bool(jnp.allclose(cstdn, cstdn_ref, rtol=1e-4, atol=1e-6))

    # Degenerate single-image / single-tile case: exercises the D-split grid
    # path (keeps both v7x TensorCores busy on tiny workloads).
    x1 = x[:1, :2, :8, :8]
    stdn1 = stdn[:1]
    out1, c1 = wiener_deconv_forward(x1, blur_kernel, stdn1,
                                     conv_weights, scale, alpha)
    out1_ref, c1_ref = wiener_deconv_forward(x1, blur_kernel, stdn1,
                                             conv_weights, scale, alpha,
                                             use_pallas=False)
    out1, c1, out1_ref, c1_ref = jax.block_until_ready((out1, c1, out1_ref, c1_ref))
    assert out1.shape == (1, D, 2, 8, 8), out1.shape
    assert bool(jnp.allclose(out1, out1_ref, rtol=1e-3, atol=1e-3)), \
        float(jnp.max(jnp.abs(out1 - out1_ref)))
    assert bool(jnp.allclose(c1, c1_ref, rtol=1e-4, atol=1e-6))

    print("KERNEL_OK")
</pallas_src>

<mosaic_0001>
module attributes {stable_mosaic.version = 11 : i64} {
  func.func @_wiener_kernel(%arg0: i32, %arg1: i32, %arg2: i32, %arg3: memref<1x4x512xf32, #tpu.memory_space<vmem>>, %arg4: memref<1x4x512xf32, #tpu.memory_space<vmem>>, %arg5: memref<1x512xf32, #tpu.memory_space<vmem>>, %arg6: memref<1x512xf32, #tpu.memory_space<vmem>>, %arg7: memref<4x1x512xf32, #tpu.memory_space<vmem>>, %arg8: memref<1x4x4x512xf32, #tpu.memory_space<vmem>>, %arg9: memref<1x4x4x512xf32, #tpu.memory_space<vmem>>) attributes {dimension_semantics = [#tpu.dimension_semantics<parallel>, #tpu.dimension_semantics<parallel>, #tpu.dimension_semantics<parallel>], iteration_bounds = array<i64: 1, 1, 2>, scalar_prefetch = 0 : i64, scratch_operands = 0 : i64, tpu.core_type = #tpu.core_type<tc>, window_params = [{transform_indices = @transform_0, window_bounds = array<i64: 1, 4, 512>}, {transform_indices = @transform_1, window_bounds = array<i64: 1, 4, 512>}, {transform_indices = @transform_2, window_bounds = array<i64: 1, 512>}, {transform_indices = @transform_3, window_bounds = array<i64: 1, 512>}, {transform_indices = @transform_4, window_bounds = array<i64: 4, 1, 512>}, {transform_indices = @transform_5, window_bounds = array<i64: 1, 4, 4, 512>}, {transform_indices = @transform_6, window_bounds = array<i64: 1, 4, 4, 512>}]} {
    %c0 = arith.constant 0 : index
    %c0_0 = arith.constant 0 : index
    %c0_1 = arith.constant 0 : index
    %0 = vector.load %arg3[%c0, %c0_0, %c0_1] : memref<1x4x512xf32, #tpu.memory_space<vmem>>, vector<1x4x512xf32>
    %1 = vector.shape_cast %0 : vector<1x4x512xf32> to vector<4x512xf32>
    %c0_2 = arith.constant 0 : index
    %c0_3 = arith.constant 0 : index
    %c0_4 = arith.constant 0 : index
    %2 = vector.load %arg4[%c0_2, %c0_3, %c0_4] : memref<1x4x512xf32, #tpu.memory_space<vmem>>, vector<1x4x512xf32>
    %3 = vector.shape_cast %2 : vector<1x4x512xf32> to vector<4x512xf32>
    %c0_5 = arith.constant 0 : index
    %c0_6 = arith.constant 0 : index
    %4 = vector.load %arg5[%c0_5, %c0_6] : memref<1x512xf32, #tpu.memory_space<vmem>>, vector<1x512xf32>
    %c0_7 = arith.constant 0 : index
    %c0_8 = arith.constant 0 : index
    %5 = vector.load %arg6[%c0_7, %c0_8] : memref<1x512xf32, #tpu.memory_space<vmem>>, vector<1x512xf32>
    %6 = arith.mulf %4, %4 : vector<1x512xf32>
    %7 = arith.mulf %5, %5 : vector<1x512xf32>
    %8 = arith.addf %6, %7 : vector<1x512xf32>
    %9 = vector.broadcast %4 : vector<1x512xf32> to vector<4x512xf32>
    %10 = arith.mulf %9, %1 : vector<4x512xf32>
    %11 = vector.broadcast %5 : vector<1x512xf32> to vector<4x512xf32>
    %12 = arith.mulf %11, %3 : vector<4x512xf32>
    %13 = arith.addf %10, %12 : vector<4x512xf32>
    %14 = vector.broadcast %4 : vector<1x512xf32> to vector<4x512xf32>
    %15 = arith.mulf %14, %3 : vector<4x512xf32>
    %16 = vector.broadcast %5 : vector<1x512xf32> to vector<4x512xf32>
    %17 = arith.mulf %16, %1 : vector<4x512xf32>
    %18 = arith.subf %15, %17 : vector<4x512xf32>
    %c0_9 = arith.constant 0 : index
    %c0_10 = arith.constant 0 : index
    %c0_11 = arith.constant 0 : index
    %19 = vector.load %arg7[%c0_9, %c0_10, %c0_11] : memref<4x1x512xf32, #tpu.memory_space<vmem>>, vector<1x1x512xf32>
    %20 = vector.shape_cast %19 : vector<1x1x512xf32> to vector<1x512xf32>
    %21 = arith.addf %8, %20 : vector<1x512xf32>
    %cst = arith.constant 1.000000e+00 : f32
    %22 = vector.broadcast %cst : f32 to vector<1x512xf32>
    %23 = arith.divf %22, %21 : vector<1x512xf32>
    %24 = vector.broadcast %23 : vector<1x512xf32> to vector<4x512xf32>
    %25 = arith.mulf %13, %24 : vector<4x512xf32>
    %c0_12 = arith.constant 0 : index
    %c0_13 = arith.constant 0 : index
    %c0_14 = arith.constant 0 : index
    %c0_15 = arith.constant 0 : index
    %26 = vector.load %arg8[%c0_12, %c0_13, %c0_14, %c0_15] : memref<1x4x4x512xf32, #tpu.memory_space<vmem>>, vector<1x1x4x512xf32>
    %27 = vector.shape_cast %26 : vector<1x1x4x512xf32> to vector<4x512xf32>
    %28 = vector.shape_cast %25 : vector<4x512xf32> to vector<1x1x4x512xf32>
    tpu.vector_store %arg8[%c0_12, %c0_13, %c0_14, %c0_15], %28 {strides = array<i32>} : memref<1x4x4x512xf32, #tpu.memory_space<vmem>>, vector<1x1x4x512xf32>,
    %29 = vector.broadcast %23 : vector<1x512xf32> to vector<4x512xf32>
    %30 = arith.mulf %18, %29 : vector<4x512xf32>
    %c0_16 = arith.constant 0 : index
    %c0_17 = arith.constant 0 : index
    %c0_18 = arith.constant 0 : index
    %c0_19 = arith.constant 0 : index
    %31 = vector.load %arg9[%c0_16, %c0_17, %c0_18, %c0_19] : memref<1x4x4x512xf32, #tpu.memory_space<vmem>>, vector<1x1x4x512xf32>
    %32 = vector.shape_cast %31 : vector<1x1x4x512xf32> to vector<4x512xf32>
    %33 = vector.shape_cast %30 : vector<4x512xf32> to vector<1x1x4x512xf32>
    tpu.vector_store %arg9[%c0_16, %c0_17, %c0_18, %c0_19], %33 {strides = array<i32>} : memref<1x4x4x512xf32, #tpu.memory_space<vmem>>, vector<1x1x4x512xf32>,
    %c1 = arith.constant 1 : index
    %c0_20 = arith.constant 0 : index
    %c0_21 = arith.constant 0 : index
    %34 = vector.load %arg7[%c1, %c0_20, %c0_21] : memref<4x1x512xf32, #tpu.memory_space<vmem>>, vector<1x1x512xf32>
    %35 = vector.shape_cast %34 : vector<1x1x512xf32> to vector<1x512xf32>
    %36 = arith.addf %8, %35 : vector<1x512xf32>
    %cst_22 = arith.constant 1.000000e+00 : f32
    %37 = vector.broadcast %cst_22 : f32 to vector<1x512xf32>
    %38 = arith.divf %37, %36 : vector<1x512xf32>
    %39 = vector.broadcast %38 : vector<1x512xf32> to vector<4x512xf32>
    %40 = arith.mulf %13, %39 : vector<4x512xf32>
    %c0_23 = arith.constant 0 : index
    %c1_24 = arith.constant 1 : index
    %c0_25 = arith.constant 0 : index
    %c0_26 = arith.constant 0 : index
    %41 = vector.load %arg8[%c0_23, %c1_24, %c0_25, %c0_26] : memref<1x4x4x512xf32, #tpu.memory_space<vmem>>, vector<1x1x4x512xf32>
    %42 = vector.shape_cast %41 : vector<1x1x4x512xf32> to vector<4x512xf32>
    %43 = vector.shape_cast %40 : vector<4x512xf32> to vector<1x1x4x512xf32>
    tpu.vector_store %arg8[%c0_23, %c1_24, %c0_25, %c0_26], %43 {strides = array<i32>} : memref<1x4x4x512xf32, #tpu.memory_space<vmem>>, vector<1x1x4x512xf32>,
    %44 = vector.broadcast %38 : vector<1x512xf32> to vector<4x512xf32>
    %45 = arith.mulf %18, %44 : vector<4x512xf32>
    %c0_27 = arith.constant 0 : index
    %c1_28 = arith.constant 1 : index
    %c0_29 = arith.constant 0 : index
    %c0_30 = arith.constant 0 : index
    %46 = vector.load %arg9[%c0_27, %c1_28, %c0_29, %c0_30] : memref<1x4x4x512xf32, #tpu.memory_space<vmem>>, vector<1x1x4x512xf32>
    %47 = vector.shape_cast %46 : vector<1x1x4x512xf32> to vector<4x512xf32>
    %48 = vector.shape_cast %45 : vector<4x512xf32> to vector<1x1x4x512xf32>
    tpu.vector_store %arg9[%c0_27, %c1_28, %c0_29, %c0_30], %48 {strides = array<i32>} : memref<1x4x4x512xf32, #tpu.memory_space<vmem>>, vector<1x1x4x512xf32>,
    %c2 = arith.constant 2 : index
    %c0_31 = arith.constant 0 : index
    %c0_32 = arith.constant 0 : index
    %49 = vector.load %arg7[%c2, %c0_31, %c0_32] : memref<4x1x512xf32, #tpu.memory_space<vmem>>, vector<1x1x512xf32>
    %50 = vector.shape_cast %49 : vector<1x1x512xf32> to vector<1x512xf32>
    %51 = arith.addf %8, %50 : vector<1x512xf32>
    %cst_33 = arith.constant 1.000000e+00 : f32
    %52 = vector.broadcast %cst_33 : f32 to vector<1x512xf32>
    %53 = arith.divf %52, %51 : vector<1x512xf32>
    %54 = vector.broadcast %53 : vector<1x512xf32> to vector<4x512xf32>
    %55 = arith.mulf %13, %54 : vector<4x512xf32>
    %c0_34 = arith.constant 0 : index
    %c2_35 = arith.constant 2 : index
    %c0_36 = arith.constant 0 : index
    %c0_37 = arith.constant 0 : index
    %56 = vector.load %arg8[%c0_34, %c2_35, %c0_36, %c0_37] : memref<1x4x4x512xf32, #tpu.memory_space<vmem>>, vector<1x1x4x512xf32>
    %57 = vector.shape_cast %56 : vector<1x1x4x512xf32> to vector<4x512xf32>
    %58 = vector.shape_cast %55 : vector<4x512xf32> to vector<1x1x4x512xf32>
    tpu.vector_store %arg8[%c0_34, %c2_35, %c0_36, %c0_37], %58 {strides = array<i32>} : memref<1x4x4x512xf32, #tpu.memory_space<vmem>>, vector<1x1x4x512xf32>,
    %59 = vector.broadcast %53 : vector<1x512xf32> to vector<4x512xf32>
    %60 = arith.mulf %18, %59 : vector<4x512xf32>
    %c0_38 = arith.constant 0 : index
    %c2_39 = arith.constant 2 : index
    %c0_40 = arith.constant 0 : index
    %c0_41 = arith.constant 0 : index
    %61 = vector.load %arg9[%c0_38, %c2_39, %c0_40, %c0_41] : memref<1x4x4x512xf32, #tpu.memory_space<vmem>>, vector<1x1x4x512xf32>
    %62 = vector.shape_cast %61 : vector<1x1x4x512xf32> to vector<4x512xf32>
    %63 = vector.shape_cast %60 : vector<4x512xf32> to vector<1x1x4x512xf32>
    tpu.vector_store %arg9[%c0_38, %c2_39, %c0_40, %c0_41], %63 {strides = array<i32>} : memref<1x4x4x512xf32, #tpu.memory_space<vmem>>, vector<1x1x4x512xf32>,
    %c3 = arith.constant 3 : index
    %c0_42 = arith.constant 0 : index
    %c0_43 = arith.constant 0 : index
    %64 = vector.load %arg7[%c3, %c0_42, %c0_43] : memref<4x1x512xf32, #tpu.memory_space<vmem>>, vector<1x1x512xf32>
    %65 = vector.shape_cast %64 : vector<1x1x512xf32> to vector<1x512xf32>
    %66 = arith.addf %8, %65 : vector<1x512xf32>
    %cst_44 = arith.constant 1.000000e+00 : f32
    %67 = vector.broadcast %cst_44 : f32 to vector<1x512xf32>
    %68 = arith.divf %67, %66 : vector<1x512xf32>
    %69 = vector.broadcast %68 : vector<1x512xf32> to vector<4x512xf32>
    %70 = arith.mulf %13, %69 : vector<4x512xf32>
    %c0_45 = arith.constant 0 : index
    %c3_46 = arith.constant 3 : index
    %c0_47 = arith.constant 0 : index
    %c0_48 = arith.constant 0 : index
    %71 = vector.load %arg8[%c0_45, %c3_46, %c0_47, %c0_48] : memref<1x4x4x512xf32, #tpu.memory_space<vmem>>, vector<1x1x4x512xf32>
    %72 = vector.shape_cast %71 : vector<1x1x4x512xf32> to vector<4x512xf32>
    %73 = vector.shape_cast %70 : vector<4x512xf32> to vector<1x1x4x512xf32>
    tpu.vector_store %arg8[%c0_45, %c3_46, %c0_47, %c0_48], %73 {strides = array<i32>} : memref<1x4x4x512xf32, #tpu.memory_space<vmem>>, vector<1x1x4x512xf32>,
    %74 = vector.broadcast %68 : vector<1x512xf32> to vector<4x512xf32>
    %75 = arith.mulf %18, %74 : vector<4x512xf32>
    %c0_49 = arith.constant 0 : index
    %c3_50 = arith.constant 3 : index
    %c0_51 = arith.constant 0 : index
    %c0_52 = arith.constant 0 : index
    %76 = vector.load %arg9[%c0_49, %c3_50, %c0_51, %c0_52] : memref<1x4x4x512xf32, #tpu.memory_space<vmem>>, vector<1x1x4x512xf32>
    %77 = vector.shape_cast %76 : vector<1x1x4x512xf32> to vector<4x512xf32>
    %78 = vector.shape_cast %75 : vector<4x512xf32> to vector<1x1x4x512xf32>
    tpu.vector_store %arg9[%c0_49, %c3_50, %c0_51, %c0_52], %78 {strides = array<i32>} : memref<1x4x4x512xf32, #tpu.memory_space<vmem>>, vector<1x1x4x512xf32>,
    return
  }
  func.func @transform_0(%arg0: i32, %arg1: i32, %arg2: i32) -> (i32, i32, i32) {
    %c0_i32 = arith.constant 0 : i32
    %c0_i32_0 = arith.constant 0 : i32
    return %arg2, %c0_i32, %arg1 : i32, i32, i32
  }
  func.func @transform_1(%arg0: i32, %arg1: i32, %arg2: i32) -> (i32, i32, i32) {
    %c0_i32 = arith.constant 0 : i32
    %c0_i32_0 = arith.constant 0 : i32
    return %arg2, %c0_i32, %arg1 : i32, i32, i32
  }
  func.func @transform_2(%arg0: i32, %arg1: i32, %arg2: i32) -> (i32, i32) {
    %c0_i32 = arith.constant 0 : i32
    %c0_i32_0 = arith.constant 0 : i32
    return %c0_i32, %arg1 : i32, i32
  }
  func.func @transform_3(%arg0: i32, %arg1: i32, %arg2: i32) -> (i32, i32) {
    %c0_i32 = arith.constant 0 : i32
    %c0_i32_0 = arith.constant 0 : i32
    return %c0_i32, %arg1 : i32, i32
  }
  func.func @transform_4(%arg0: i32, %arg1: i32, %arg2: i32) -> (i32, i32, i32) {
    %c0_i32 = arith.constant 0 : i32
    %c0_i32_0 = arith.constant 0 : i32
    return %arg0, %c0_i32, %arg1 : i32, i32, i32
  }
  func.func @transform_5(%arg0: i32, %arg1: i32, %arg2: i32) -> (i32, i32, i32, i32) {
    %c0_i32 = arith.constant 0 : i32
    %c0_i32_0 = arith.constant 0 : i32
    return %arg2, %arg0, %c0_i32, %arg1 : i32, i32, i32, i32
  }
  func.func @transform_6(%arg0: i32, %arg1: i32, %arg2: i32) -> (i32, i32, i32, i32) {
    %c0_i32 = arith.constant 0 : i32
    %c0_i32_0 = arith.constant 0 : i32
    return %arg2, %arg0, %c0_i32, %arg1 : i32, i32, i32, i32
  }
}

</mosaic_0001>

<bundles_post_ra>
// kernel: tpu_custom_call.1
= control target key start
LH: loop header
LB: loop body
LE: loop exit
PB: predicated region body
PF: predicated region fallthrough
CT: control target
= control target key end

     0   :  { %s1767_s0 = inlined_call_operand.hbm [shape: f32[2,4,512], index: 0, kind: input, shape index: {}]   ;;  %s1768_s1 = inlined_call_operand.hbm [shape: f32[2,4,512], index: 1, kind: input, shape index: {}]   ;;  %s1769_s2 = inlined_call_operand.vmem [shape: f32[1,512], index: 2, kind: input, shape index: {}]   ;;  %s1770_s3 = inlined_call_operand.vmem [shape: f32[1,512], index: 3, kind: input, shape index: {}]   ;;  %s1771_s4 = inlined_call_operand.hbm [shape: f32[4,1,512], index: 4, kind: input, shape index: {}]   ;;  %s1772_s5 = inlined_call_operand.hbm [shape: f32[2,4,4,512], index: 5, kind: output, shape index: {0}]   ;;  %s1773_s6 = inlined_call_operand.hbm [shape: f32[2,4,4,512], index: 6, kind: output, shape index: {1}]  }
   0x1   :  { %1781 = sst [smem:[#allocation20_spill]] %s1771_s4 }
   0x2   :  { %12 = vsyncpa [#allocation3], 0 }
   0x3   :  { %14 = vsyncpa [#allocation3 + $0x1], 0 }
   0x4   :  { %15 = vsyncpa [#allocation6], 0 }
   0x5   :  { %17 = vsyncpa [#allocation6 + $0x1], 0 }
   0x6   :  { %18 = vsyncpa [#allocation4], 0 }
   0x7   :  { %20 = vsyncpa [#allocation4 + $0x1], 0 }
   0x8   :  { %21 = vsyncpa [#allocation10], 0 }
   0x9   :  { %23 = vsyncpa [#allocation10 + $0x1], 0  ;;  %s1369_s21 = smov 0   ;;  %s1371_s22 = smov 0  }
   0xa   :  { %s1373_s23 = smov 0   ;;  %s1375_s24 = smov 0  }
   0xb   :  { %s1377_s25 = smov 0   ;;  %s1379_s26 = smov 0  }
   0xc LB: > { %1782 = sst [smem:[#allocation16_spill]] %s1311_s23  ;;  %s1400_s27 = sadd.s32 4294967295, %s1323_s26   ;;  %s1323_s26 = sphi %s1379_s26, %s29_s26   ;;  %s1319_s25 = sphi %s1377_s25, %s1805_s25   ;;  %s1315_s24 = sphi %s1375_s24, %s1804_s24   ;;  %s1311_s23 = sphi %s1373_s23, %s1803_s23   ;;  %s1307_s22 = sphi %s1371_s22, %s1807_s22   ;;  %s1303_s21 = sphi %s1369_s21, %s1806_s21  }
   0xd   : > { %1783 = sst [smem:[#allocation17_spill]] %s1319_s25  ;;  %s972_s28 = sadd.s32 4294967294, %s1323_s26  }
   0xe   : > { %p70_p0 = scmp.ne.s32.totalorder %s1307_s22, %s1303_s21  ;;  %p1774_p1 = scmp.eq.s32.totalorder %s1400_s27, 0 }
   0xf   : > { %p212_p3 = scmp.eq.s32.totalorder %s972_s28, 1  ;;  %p973_p5 = scmp.ge.s32.totalorder %s1323_s26, 1 }
  0x10   : > { %p1409_p4 = por %p1774_p1, %p70_p0  ;;  %p249_p7 = scmp.lt.s32.totalorder %s1323_s26, 3 }
  0x11   : > { %p1414_p6 = por %p212_p3, %p70_p0  ;;  %s1325_s8 = smov [#allocation7]  }
  0x12   : > { %s1784_s29 = scalar_select %p1409_p4, 1, 0 }
  0x13   : > { %s1785_s30 = scalar_select %p1414_p6, 1, 0 }
  0x14   : > { %p1419_p8 = pnand %p973_p5, %p249_p7  ;;  %s283_s9 = sshll.u32 %s1325_s8, 4  ;;  %s284_s9 = int_to_ptr.vmem [resolvable:$true] %s283_s9 }
  0x15   : > { %s41_s11 = sadd.s32 1, %s1319_s25  ;;  %s1788_s4 = sld [smem:[#allocation20_spill]] }
  0x16   : > { %s1786_s7 = scalar_select %p1419_p8, 1, 0 }
  0x17   : > { %p1026_p9 = pneg %p1419_p8 }
  0x19   : > { %p1428_p11 = pnand %p1026_p9, %p1774_p1 }
  0x1b   : > { %s1113_s14 = scalar_lea.hbm %s1788_s4, 256  ;;  %p1115_p13 = pneg %p1428_p11 }
  0x1c   : > { %p1114_p12 = scmp.ne.s32.totalorder %s1788_s4, %s1113_s14  ;;  %p1120_p5 = scmp.lt.u32.totalorder %s1113_s14, %s1788_s4 }
  0x1e   : > { %p1116_p0 = pnand %p1115_p13, %p1114_p12 }
  0x20   : > { %p1117_p3 = pneg %p1116_p0 }
  0x22   : > { %p1122_p7 = pnand %p1120_p5, %p1117_p3 }
  0x24   : > { %1125 = shalt.err (!%p1122_p7)
}
  0x25   : > { %s1126_s19 = scalar_lea.vmem %s284_s9, 256  ;;  %p1134_p2 = scmp.lt.s32.totalorder %s284_s9, %s284_s9 }
  0x26   : > { %p1127_p9 = scmp.ne.s32.totalorder %s284_s9, %s1126_s19  ;;  %p1135_p6 = scmp.lt.s32.totalorder %s1126_s19, %s1126_s19 }
  0x28   : > { %p1129_p10 = pnand %p1127_p9, %p1115_p13  ;;  %p1136_p4 = por %p1135_p6, %p1134_p2 }
  0x2a   : > { %p1130_p1 = pneg %p1129_p10 }
  0x2c   : > { %p1137_p8 = pnand %p1136_p4, %p1130_p1 }
  0x2e   : > { %1140 = shalt.err (!%p1137_p8)
}
  0x2f   : > { %s1326_s20 = smov 64   ;;  %s1327_s28 = smov 4  }
  0x30   : > { %1029 = dma.hbm_to_vmem [thread:$0]  (!%p1428_p11), %s1788_s4, 256, %s284_s9, [#allocation6], %s1326_s20, %s1326_s20, %s1327_s28  }
  0x31   : > { %p42_p1 = scmp.ge.s32.totalorder %s41_s11, 2  ;;  %s57_s13 = sadd.s32 1, %s1311_s23 }
  0x32   : > { %p64_p2 = scmp.ne.s32.totalorder %s1311_s23, %s1307_s22  ;;  %p65_p4 = scmp.eq.s32.totalorder %s1323_s26, 0 }
  0x33   : > { %s1809_s11 = smov (%p42_p1, %s41_s11), 0  ;;  %p1791_p8 = scmp.eq.s32.totalorder %s1400_s27, 1 }
  0x34   : > { %1789 = sst [smem:[#allocation18_spill]] %s1809_s11  ;;  %p1455_p6 = por %p65_p4, %p64_p2 }
  0x35   : > { %p1461_p10 = por %p1791_p8, %p64_p2  ;;  %s52_s15 = ssub.s32 %s1319_s25, %s1809_s11 }
  0x36   : > { %p1045_p11 = scmp.lt.s32.totalorder %s1323_s26, 2  ;;  %p55_p12 = scmp.eq.s32.totalorder %s52_s15, 0 }
  0x37   : > { %s1792_s10 = scalar_select %p1461_p10, 1, 0 }
  0x38   : > { %s297_s9 = sand.u32 1, %s1311_s23   ;;  %s1010_s18 = sshll.u32 %s1319_s25, 8 }
  0x39   : > { %s1469_s16 = sshll.u32 %s297_s9, 4  ;;  %s1478_s28 = scalar_lea.hbm %s1767_s0, %s1010_s18 }
  0x3a   : > { %s1472_s17 = scalar_select %p55_p12, %s1311_s23, %s57_s13  }
  0x3b   : > { %s301_s8 = scalar_lea.vmem [#allocation2], %s1469_s16  ;;  %p1485_p13 = pnand %p1045_p11, %p1455_p6 }
  0x3c   : > { %1793 = sst [smem:[#allocation19_spill]] %s1472_s17  ;;  %s311_s12 = sshll.u32 %s301_s8, 4  ;;  %s1481_s12 = int_to_ptr.vmem [resolvable:$true] %s311_s12 }
  0x3d   : > { %s1492_s19 = scalar_lea.hbm %s1768_s1, %s1010_s18  ;;  %s318_s20 = sand.u32 1, %s1323_s26  }
  0x3e   : > { %s298_s11 = scalar_lea.sflag [#allocation3], %s297_s9  ;;  %s1141_s25 = scalar_lea.hbm %s1478_s28, 256 }
  0x3f   : > { %p1142_p0 = scmp.ne.s32.totalorder %s1478_s28, %s1141_s25  ;;  %p1143_p3 = pneg %p1485_p13 }
  0x40   : > { %s1146_s17 = scalar_lea.hbm %s1767_s0, 512  ;;  %p1147_p9 = scmp.lt.u32.totalorder %s1478_s28, %s1767_s0 }
  0x41   : > { %p1144_p5 = pnand %p1143_p3, %p1142_p0  ;;  %p1148_p1 = scmp.lt.u32.totalorder %s1146_s17, %s1141_s25 }
  0x42   : > { %p1150_p4 = scmp.lt.u32.totalorder %s1141_s25, %s1478_s28 }
  0x43   : > { %p1145_p7 = pneg %p1144_p5  ;;  %p1149_p2 = por %p1148_p1, %p1147_p9 }
  0x45   : > { %p1151_p6 = por %p1150_p4, %p1149_p2 }
  0x47   : > { %p1152_p8 = pnand %p1151_p6, %p1145_p7 }
  0x49   : > { %1155 = shalt.err (!%p1152_p8)
}
  0x4a   : > { %s1156_s9 = scalar_lea.vmem %s1481_s12, 256  ;;  %s1328_s18 = smov [#allocation2]  }
  0x4b   : > { %p1157_p11 = scmp.ne.s32.totalorder %s1481_s12, %s1156_s9  ;;  %s1161_s13 = sshll.u32 %s1328_s18, 4  ;;  %s1162_s13 = int_to_ptr.vmem [resolvable:$false] %s1161_s13 }
  0x4c   : > { %s1163_s23 = scalar_lea.vmem %s1162_s13, 512  ;;  %p1164_p5 = scmp.lt.s32.totalorder %s1481_s12, %s1162_s13 }
  0x4d   : > { %p1159_p12 = pnand %p1157_p11, %p1143_p3  ;;  %p1165_p9 = scmp.lt.s32.totalorder %s1163_s23, %s1156_s9 }
  0x4f   : > { %p1160_p0 = pneg %p1159_p12  ;;  %p1166_p1 = por %p1165_p9, %p1164_p5 }
  0x51   : > { %p1167_p2 = pnand %p1166_p1, %p1160_p0 }
  0x53   : > { %1170 = shalt.err (!%p1167_p2)
}
  0x54   : > { %1033 = dma.hbm_to_vmem [thread:$0]  (!%p1485_p13), %s1478_s28, 256, %s1481_s12, %s298_s11  }
  0x55   : > { %s322_s25 = scalar_lea.vmem [#allocation5], %s1469_s16  ;;  %s319_s14 = scalar_lea.sflag [#allocation6], %s318_s20 }
  0x56   : > { %s332_s17 = sshll.u32 %s322_s25, 4  ;;  %s1171_s8 = scalar_lea.hbm %s1492_s19, 256  ;;  %s333_s17 = int_to_ptr.vmem [resolvable:$true] %s332_s17 }
  0x57   : > { %p1172_p7 = scmp.ne.s32.totalorder %s1492_s19, %s1171_s8  ;;  %s1176_s18 = scalar_lea.hbm %s1768_s1, 512 }
  0x58   : > { %p1177_p8 = scmp.lt.u32.totalorder %s1492_s19, %s1768_s1  ;;  %p1178_p11 = scmp.lt.u32.totalorder %s1176_s18, %s1171_s8 }
  0x59   : > { %p1174_p4 = pnand %p1172_p7, %p1143_p3  ;;  %p1180_p0 = scmp.lt.u32.totalorder %s1171_s8, %s1492_s19 }
  0x5a   : > { %p1179_p12 = por %p1178_p11, %p1177_p8 }
  0x5b   : > { %p1175_p6 = pneg %p1174_p4 }
  0x5c   : > { %p1181_p5 = por %p1180_p0, %p1179_p12 }
  0x5e   : > { %p1182_p9 = pnand %p1181_p5, %p1175_p6 }
  0x60   : > { %1185 = shalt.err (!%p1182_p9)
}
  0x61   : > { %s1186_s11 = scalar_lea.vmem %s333_s17, 256  ;;  %s1329_s16 = smov [#allocation5]  }
  0x62   : > { %p1187_p1 = scmp.ne.s32.totalorder %s333_s17, %s1186_s11  ;;  %s1191_s28 = sshll.u32 %s1329_s16, 4  ;;  %s1192_s28 = int_to_ptr.vmem [resolvable:$false] %s1191_s28 }
  0x63   : > { %s1193_s12 = scalar_lea.vmem %s1192_s28, 512  ;;  %p1194_p4 = scmp.lt.s32.totalorder %s333_s17, %s1192_s28 }
  0x64   : > { %p1189_p2 = pnand %p1187_p1, %p1143_p3  ;;  %p1195_p10 = scmp.lt.s32.totalorder %s1193_s12, %s1186_s11 }
  0x66   : > { %p1190_p7 = pneg %p1189_p2  ;;  %p1196_p8 = por %p1195_p10, %p1194_p4 }
  0x68   : > { %p1197_p11 = pnand %p1196_p8, %p1190_p7 }
  0x6a   : > { %1200 = shalt.err (!%p1197_p11)
}
  0x6b   : > { %1036 = dma.hbm_to_vmem [thread:$0]  (!%p1485_p13), %s1492_s19, 256, %s333_s17, %s319_s14  }
  0x6c   : > { %p1795_p6 = scmp.ne.s32.totalorder %s1786_s7, 0 }
  0x6d   : > { %s1545_s20 = sand.u32 (!%p1795_p6), 1, %s1307_s22   ;;  %p1796_p3 = scmp.ne.s32.totalorder (!%p1795_p6), %s1784_s29, 0 }
  0x6e   : > { %341 = sbr.rel (%p1795_p6) target bundleno = 201 (0xc9), region = 40  ;;  %s985_s25 = sshll.u32 (!%p1795_p6), %s1545_s20, 4 }
  0x6f   : > { %s344_s8 = scalar_lea.sflag (!%p1795_p6), [#allocation3], %s1545_s20  ;;  %s347_s4 = scalar_lea.vmem (!%p1795_p6), [#allocation2], %s985_s25 }
  0x75   : > { %1282 = dma.done.wait (%p1796_p3), %s344_s8, 256  }
  0x76   : > { %1284 = vsyncadd (%p1796_p3), %s344_s8, 4294967040  ;;  %s352_s15 = sand.u32 1, %s1400_s27   ;;  %s356_s7 = scalar_lea.vmem [#allocation5], %s985_s25 }
  0x77   : > { %s353_s19 = scalar_lea.sflag [#allocation6], %s352_s15 }
  0x78   : > { %1286 = dma.done.wait (%p1796_p3), %s353_s19, 256  }
  0x79   : > { %1288 = vsyncadd (%p1796_p3), %s353_s19, 4294967040  ;;  %p1797_p10 = scmp.eq.s32.totalorder %s1400_s27, 0 }
  0x7b   : > { %1290 = dma.done.wait (%p1797_p10), [#allocation6], 256   ;;  %p1798_p13 = pmov %p1797_p10 }
  0x7c   : > { %v435_v0 = vlaneseq  ;;  %v429_v2 = vld [vmem:[%s1769_s2] sm:$0xf]  ;;  %v566_v10 = vld [vmem:[#allocation7 + $0x4] sm:$0xf]  ;;  %v426_v15 = vld [vmem:[%s347_s4 + $0x8] sm:$0xff]  ;;  %s988_s27 = sshll.u32 %s1545_s20, 6 }
  0x7d   : > { %1292 = vsyncadd (%p1798_p13), [#allocation6], 4294967040  ;;  %v430_v3 = vld [vmem:[%s1770_s3] sm:$0xf]  ;;  %v431_v4 = vmul.f32 %v429_v2, %v429_v2  ;;  %v428_v19 = vld [vmem:[%s356_s7 + $0x8] sm:$0xff]  ;;  %v458_v29 = vcombine.high %v426_v15, %v426_v15  ;;  %s1623_s29 = scalar_lea.vmem [#allocation8], %s988_s27 }
  0x7e   : > { %v436_v1 = vshrl.u32 %v435_v0, 7  ;;  %v425_v7 = vld [vmem:[%s347_s4] sm:$0xff]  ;;  %v432_v8 = vmul.f32 %v430_v3, %v430_v3  ;;  %v622_v24 = vld [vmem:[#allocation7 + $0x8] sm:$0xf]  ;;  %v678_v26 = vld [vmem:[#allocation7 + $0xc] sm:$0xf]  ;;  %v489_v32 = vcombine.high %v428_v19, %v428_v19 }
  0x7f   : > { %v512_v9 = vld [vmem:[#allocation7] sm:$0xf]  ;;  %v457_v18 = vcombine.high %v425_v7, %v425_v7  ;;  %s1632_s13 = scalar_lea.vmem [#allocation9], %s988_s27  ;;  %s757_s23 = sshll.u32 %s1623_s29, 4  ;;  %s1665_s23 = int_to_ptr.vmem [resolvable:$true] %s757_s23 }
  0x80   : > { %v1568_v5 = vsub.s32 0, %v436_v1  ;;  %v1570_v6 = vsub.s32 1, %v436_v1  ;;  %v1572_v11 = vsub.s32 2, %v436_v1  ;;  %v1574_v12 = vsub.s32 3, %v436_v1  ;;  %v427_v13 = vld [vmem:[%s356_s7] sm:$0xff]  ;;  %s778_s11 = sshll.u32 %s1632_s13, 4  ;;  %s1673_s11 = int_to_ptr.vmem [resolvable:$true] %s778_s11 }
  0x81   : > { %v433_v14 = vadd.f32 %v432_v8, %v431_v4  ;;  %v488_v25 = vcombine.high %v427_v13, %v427_v13  ;;  %s1012_s16 = sshll.u32 %s1315_s24, 10  ;;  %s734_s15 = scalar_lea.sflag [#allocation4], %s1545_s20 }
  0x82   : > { %v438_v16 = vrot.slane %v429_v2, %v1568_v5  ;;  %v442_v17 = vrot.slane %v429_v2, %v1570_v6  ;;  %v469_v20 = vrot.slane %v430_v3, %v1568_v5  ;;  %v473_v21 = vrot.slane %v430_v3, %v1570_v6  ;;  %s1679_s12 = scalar_lea.hbm %s1772_s5, %s1012_s16  ;;  %s1686_s4 = scalar_lea.hbm %s1773_s6, %s1012_s16 }
  0x83   : > { %v513_v22 = vadd.f32 %v512_v9, %v433_v14  ;;  %v567_v23 = vadd.f32 %v566_v10, %v433_v14  ;;  %v446_v27 = vrot.slane %v429_v2, %v1572_v11  ;;  %v450_v28 = vrot.slane %v429_v2, %v1574_v12  ;;  %s1201_s19 = scalar_lea.vmem %s1665_s23, 1024  ;;  %p1799_p0 = scmp.ne.s32.totalorder %s1792_s10, 0 }
  0x84   : > { %v477_v30 = vrot.slane %v430_v3, %v1572_v11  ;;  %v481_v31 = vrot.slane %v430_v3, %v1574_v12  ;;  %v623_v33 = vadd.f32 %v622_v24, %v433_v14  ;;  %v461_v34 = vmul.f32 %v438_v16, %v425_v7  ;;  %p1202_p12 = scmp.ne.s32.totalorder %s1665_s23, %s1201_s19  ;;  %s1330_s7 = smov [#allocation8]  }
  0x85   : > { %1105 = vrcp.f32 %v513_v22  ;;  %v462_v35 = vmul.f32 %v457_v18, %v442_v17  ;;  %v679_v36 = vadd.f32 %v678_v26, %v433_v14  ;;  %v492_v37 = vmul.f32 %v469_v20, %v427_v13  ;;  %s1205_s17 = sshll.u32 %s1330_s7, 4  ;;  %s1206_s17 = int_to_ptr.vmem [resolvable:$false] %s1205_s17 }
  0x86   : > { %1107 = vrcp.f32 %v567_v23  ;;  %v493_v38 = vmul.f32 %v488_v25, %v473_v21  ;;  %v463_v39 = vmul.f32 %v446_v27, %v426_v15  ;;  %v464_v40 = vmul.f32 %v458_v29, %v450_v28  ;;  %p1203_p5 = pnand %p1202_p12, %p1799_p0  ;;  %s1207_s14 = scalar_lea.vmem %s1206_s17, 2048 }
  0x87   : > { %v494_v41 = vmul.f32 %v477_v30, %v428_v19  ;;  %v495_v42 = vmul.f32 %v489_v32, %v481_v31  ;;  %v500_v43 = vmul.f32 %v438_v16, %v427_v13  ;;  %v501_v44 = vmul.f32 %v488_v25, %v442_v17  ;;  %p1208_p1 = scmp.lt.s32.totalorder %s1665_s23, %s1206_s17  ;;  %p1209_p2 = scmp.lt.s32.totalorder %s1207_s14, %s1201_s19 }
  0x88   : > { %1109 = vrcp.f32 %v623_v33  ;;  %v504_v45 = vmul.f32 %v469_v20, %v425_v7  ;;  %v505_v46 = vmul.f32 %v473_v21, %v457_v18  ;;  %v502_v47 = vmul.f32 %v446_v27, %v428_v19  ;;  %p1204_p9 = pneg %p1203_p5 }
  0x89   : > { %1111 = vrcp.f32 %v679_v36  ;;  %v503_v48 = vmul.f32 %v489_v32, %v450_v28  ;;  %v506_v49 = vmul.f32 %v477_v30, %v426_v15  ;;  %v507_v50 = vmul.f32 %v481_v31, %v458_v29  ;;  %p1210_p7 = por %p1209_p2, %p1208_p1 }
  0x8a   : > { %v1584_v51 = vadd.f32 %v492_v37, %v461_v34  ;;  %v1586_v52 = vadd.f32 %v493_v38, %v462_v35  ;;  %v1588_v53 = vadd.f32 %v494_v41, %v463_v39  ;;  %v1590_v54 = vadd.f32 %v495_v42, %v464_v40 }
  0x8b   : > { %v1592_v56 = vsub.f32 %v500_v43, %v504_v45  ;;  %v1594_v57 = vsub.f32 %v501_v44, %v505_v46  ;;  %v1596_v58 = vsub.f32 %v502_v47, %v506_v49  ;;  %v1598_v59 = vsub.f32 %v503_v48, %v507_v50  ;;  %p1211_p4 = pnand %p1210_p7, %p1204_p9 }
  0x8f   : > { %v1106_v55 = vpop.eup %1105 }
  0x90   : > { %v1108_v60 = vpop.eup %1107  ;;  %v520_v61 = vrot.slane %v1106_v55, %v1568_v5  ;;  %v524_v62 = vrot.slane %v1106_v55, %v1570_v6  ;;  %v528_v63 = vrot.slane %v1106_v55, %v1572_v11  ;;  %v532_v0 = vrot.slane %v1106_v55, %v1574_v12 }
  0x91   : > { %v574_v1 = vrot.slane %v1108_v60, %v1568_v5  ;;  %v578_v2 = vrot.slane %v1108_v60, %v1570_v6  ;;  %v582_v3 = vrot.slane %v1108_v60, %v1572_v11  ;;  %v586_v4 = vrot.slane %v1108_v60, %v1574_v12 }
  0x92   : > { %v537_v7 = vmul.f32 %v520_v61, %v1584_v51  ;;  %v538_v8 = vmul.f32 %v524_v62, %v1586_v52  ;;  %v539_v9 = vmul.f32 %v528_v63, %v1588_v53  ;;  %v540_v10 = vmul.f32 %v532_v0, %v1590_v54  ;;  %v1110_v17 = vpop.eup %1109 }
  0x93   : > { %v551_v13 = vmul.f32 %v520_v61, %v1592_v56  ;;  %v552_v14 = vmul.f32 %v524_v62, %v1594_v57  ;;  %v553_v15 = vmul.f32 %v528_v63, %v1596_v58  ;;  %v554_v16 = vmul.f32 %v532_v0, %v1598_v59  ;;  %v1112_v22 = vpop.eup %1111 }
  0x94   : > { %v545_v18 = vcombine.low %v537_v7, %v538_v8  ;;  %v546_v19 = vcombine.low %v539_v9, %v540_v10  ;;  %v591_v20 = vmul.f32 %v574_v1, %v1584_v51  ;;  %v592_v21 = vmul.f32 %v578_v2, %v1586_v52 }
  0x95   : > { %v559_v23 = vcombine.low %v551_v13, %v552_v14  ;;  %v560_v24 = vcombine.low %v553_v15, %v554_v16  ;;  %v593_v25 = vmul.f32 %v582_v3, %v1588_v53  ;;  %v594_v26 = vmul.f32 %v586_v4, %v1590_v54 }
  0x96   : > { %549 = vst [vmem:[%s1623_s29] sm:$0xff] %v545_v18  ;;  %550 = vst [vmem:[%s1623_s29 + $0x8] sm:$0xff] %v546_v19  ;;  %v599_v27 = vcombine.low %v591_v20, %v592_v21  ;;  %v606_v28 = vmul.f32 %v574_v1, %v1592_v56  ;;  %v607_v29 = vmul.f32 %v578_v2, %v1594_v57 }
  0x97   : > { %v608_v30 = vmul.f32 %v582_v3, %v1596_v58  ;;  %563 = vst [vmem:[%s1632_s13] sm:$0xff] %v559_v23  ;;  %564 = vst [vmem:[%s1632_s13 + $0x8] sm:$0xff] %v560_v24  ;;  %v600_v31 = vcombine.low %v593_v25, %v594_v26  ;;  %v609_v32 = vmul.f32 %v586_v4, %v1598_v59 }
  0x98   : > { %v630_v33 = vrot.slane %v1110_v17, %v1568_v5  ;;  %v634_v34 = vrot.slane %v1110_v17, %v1570_v6  ;;  %990 = vst [vmem:[%s1623_s29 + $0x10] sm:$0xff] %v599_v27  ;;  %v614_v35 = vcombine.low %v606_v28, %v607_v29  ;;  %v638_v36 = vrot.slane %v1110_v17, %v1572_v11 }
  0x99   : > { %v642_v37 = vrot.slane %v1110_v17, %v1574_v12  ;;  %v686_v38 = vrot.slane %v1112_v22, %v1568_v5  ;;  %991 = vst [vmem:[%s1623_s29 + $0x18] sm:$0xff] %v600_v31  ;;  %v615_v39 = vcombine.low %v608_v30, %v609_v32  ;;  %v690_v48 = vrot.slane %v1112_v22, %v1570_v6 }
  0x9a   : > { %v647_v40 = vmul.f32 %v630_v33, %v1584_v51  ;;  %v648_v41 = vmul.f32 %v634_v34, %v1586_v52  ;;  %v662_v42 = vmul.f32 %v630_v33, %v1592_v56  ;;  %992 = vst [vmem:[%s1632_s13 + $0x10] sm:$0xff] %v614_v35  ;;  %v649_v43 = vmul.f32 %v638_v36, %v1588_v53 }
  0x9b   : > { %v650_v44 = vmul.f32 %v642_v37, %v1590_v54  ;;  %v663_v45 = vmul.f32 %v634_v34, %v1594_v57  ;;  %v664_v46 = vmul.f32 %v638_v36, %v1596_v58  ;;  %993 = vst [vmem:[%s1632_s13 + $0x18] sm:$0xff] %v615_v39  ;;  %v665_v47 = vmul.f32 %v642_v37, %v1598_v59 }
  0x9c   : > { %v655_v5 = vcombine.low %v647_v40, %v648_v41  ;;  %v703_v49 = vmul.f32 %v686_v38, %v1584_v51  ;;  %v694_v60 = vrot.slane %v1112_v22, %v1572_v11  ;;  %v698_v61 = vrot.slane %v1112_v22, %v1574_v12 }
  0x9d   : > { %v656_v50 = vcombine.low %v649_v43, %v650_v44  ;;  %v670_v55 = vcombine.low %v662_v42, %v663_v45  ;;  %v671_v62 = vcombine.low %v664_v46, %v665_v47  ;;  %v704_v63 = vmul.f32 %v690_v48, %v1586_v52 }
  0x9e   : > { %994 = vst [vmem:[%s1623_s29 + $0x20] sm:$0xff] %v655_v5  ;;  %v718_v0 = vmul.f32 %v686_v38, %v1592_v56  ;;  %v719_v1 = vmul.f32 %v690_v48, %v1594_v57  ;;  %v705_v6 = vmul.f32 %v694_v60, %v1588_v53  ;;  %v706_v11 = vmul.f32 %v698_v61, %v1590_v54 }
  0x9f   : > { %995 = vst [vmem:[%s1623_s29 + $0x28] sm:$0xff] %v656_v50  ;;  %996 = vst [vmem:[%s1632_s13 + $0x20] sm:$0xff] %v670_v55  ;;  %v720_v12 = vmul.f32 %v694_v60, %v1596_v58  ;;  %v721_v51 = vmul.f32 %v698_v61, %v1598_v59  ;;  %v711_v52 = vcombine.low %v703_v49, %v704_v63 }
  0xa0   : > { %997 = vst [vmem:[%s1632_s13 + $0x28] sm:$0xff] %v671_v62  ;;  %v726_v56 = vcombine.low %v718_v0, %v719_v1  ;;  %v712_v57 = vcombine.low %v705_v6, %v706_v11 }
  0xa1   : > { %v727_v2 = vcombine.low %v720_v12, %v721_v51  ;;  %998 = vst [vmem:[%s1623_s29 + $0x30] sm:$0xff] %v711_v52 }
  0xa2   : > { %1000 = vst [vmem:[%s1632_s13 + $0x30] sm:$0xff] %v726_v56  ;;  %999 = vst [vmem:[%s1623_s29 + $0x38] sm:$0xff] %v712_v57 }
  0xa3   : > { %1001 = vst [vmem:[%s1632_s13 + $0x38] sm:$0xff] %v727_v2 }
  0xa4   : > { %1214 = shalt.err (!%p1211_p4)
}
  0xa5   : > { %s1215_s9 = scalar_lea.hbm %s1679_s12, 1024  ;;  %s1219_s29 = scalar_lea.hbm %s1772_s5, 2048 }
  0xa6   : > { %p1216_p8 = scmp.ne.s32.totalorder %s1679_s12, %s1215_s9  ;;  %p1220_p3 = scmp.lt.u32.totalorder %s1679_s12, %s1772_s5 }
  0xa7   : > { %p1221_p10 = scmp.lt.u32.totalorder %s1219_s29, %s1215_s9  ;;  %p1223_p12 = scmp.lt.u32.totalorder %s1215_s9, %s1679_s12 }
  0xa8   : > { %p1217_p11 = pnand %p1216_p8, %p1799_p0 }
  0xa9   : > { %p1222_p13 = por %p1221_p10, %p1220_p3 }
  0xaa   : > { %p1218_p6 = pneg %p1217_p11 }
  0xab   : > { %p1224_p5 = por %p1223_p12, %p1222_p13 }
  0xad   : > { %p1225_p9 = pnand %p1224_p5, %p1218_p6 }
  0xaf   : > { %1228 = shalt.err (!%p1225_p9)
}
  0xb0   : > { %s1331_s24 = smov 256   ;;  %s1332_s28 = smov 16  }
  0xb1   : > { %1022 = dma.vmem_to_hbm [thread:$0]  (%p1799_p0), %s1665_s23, 1024, %s1679_s12, %s734_s15, %s1331_s24, %s1331_s24, %s1332_s28  }
  0xb2   : > { %s739_s25 = scalar_lea.sflag [#allocation10], %s1545_s20  ;;  %s1229_s8 = scalar_lea.vmem %s1673_s11, 1024 }
  0xb3   : > { %p1230_p1 = scmp.ne.s32.totalorder %s1673_s11, %s1229_s8  ;;  %s1333_s19 = smov [#allocation9]  }
  0xb4   : > { %s1233_s7 = sshll.u32 %s1333_s19, 4  ;;  %s1234_s7 = int_to_ptr.vmem [resolvable:$false] %s1233_s7 }
  0xb5   : > { %p1231_p2 = pnand %p1230_p1, %p1799_p0  ;;  %s1235_s17 = scalar_lea.vmem %s1234_s7, 2048 }
  0xb6   : > { %p1236_p4 = scmp.lt.s32.totalorder %s1673_s11, %s1234_s7  ;;  %p1237_p8 = scmp.lt.s32.totalorder %s1235_s17, %s1229_s8 }
  0xb7   : > { %p1232_p7 = pneg %p1231_p2 }
  0xb8   : > { %p1238_p11 = por %p1237_p8, %p1236_p4 }
  0xba   : > { %p1239_p6 = pnand %p1238_p11, %p1232_p7 }
  0xbc   : > { %1242 = shalt.err (!%p1239_p6)
}
  0xbd   : > { %s1243_s23 = scalar_lea.hbm %s1686_s4, 1024  ;;  %s1247_s14 = scalar_lea.hbm %s1773_s6, 2048 }
  0xbe   : > { %p1244_p3 = scmp.ne.s32.totalorder %s1686_s4, %s1243_s23  ;;  %p1248_p12 = scmp.lt.u32.totalorder %s1686_s4, %s1773_s6 }
  0xbf   : > { %p1249_p5 = scmp.lt.u32.totalorder %s1247_s14, %s1243_s23  ;;  %p1251_p1 = scmp.lt.u32.totalorder %s1243_s23, %s1686_s4 }
  0xc0   : > { %p1245_p10 = pnand %p1244_p3, %p1799_p0 }
  0xc1   : > { %p1250_p9 = por %p1249_p5, %p1248_p12 }
  0xc2   : > { %p1246_p13 = pneg %p1245_p10 }
  0xc3   : > { %p1252_p2 = por %p1251_p1, %p1250_p9 }
  0xc5   : > { %p1253_p7 = pnand %p1252_p2, %p1246_p13 }
  0xc7   : > { %1256 = shalt.err (!%p1253_p7)
}
  0xc8   : > { %1023 = dma.vmem_to_hbm [thread:$0]  (%p1799_p0), %s1673_s11, 1024, %s1686_s4, %s739_s25, %s1331_s24, %s1331_s24, %s1332_s28  }
  0xc9 PF: > { %s793_s27 = sand.u32 1, %s1303_s21   ;;  %p1800_p4 = scmp.ne.s32.totalorder %s1785_s30, 0 }
  0xca   : > { %p1801_p8 = scmp.ge.s32.totalorder %s1323_s26, 2  ;;  %s794_s29 = scalar_lea.sflag [#allocation4], %s793_s27 }
  0xcc   : > { %p1038_p11 = pnand %p1801_p8, %p1800_p4 }
  0xce   : > { %1294 = dma.done.wait (!%p1038_p11), %s794_s29, 1024  }
  0xcf   : > { %1296 = vsyncadd (!%p1038_p11), %s794_s29, 4294966272  ;;  %s803_s10 = scalar_lea.sflag [#allocation10], %s793_s27 }
  0xd0   : > { %1298 = dma.done.wait (!%p1038_p11), %s803_s10, 1024  }
  0xd1   : > { %1300 = vsyncadd (!%p1038_p11), %s803_s10, 4294966272  ;;  %s29_s26 = sadd.s32 1, %s1323_s26   ;;  %s1802_s20 = sld [smem:[#allocation16_spill]] }
  0xd2   : > { %p26_p6 = scmp.ge.s32.totalorder %s29_s26, 4   ;;  %s1803_s23 = sld [smem:[#allocation19_spill]] }
  0xd3   : > { %s1804_s24 = sld [smem:[#allocation17_spill]]  ;;  %s1805_s25 = sld [smem:[#allocation18_spill]] }
  0xd4   : > { %s1806_s21 = smov %s1307_s22  ;;  %28 = sbr.rel (!%p26_p6) target bundleno = 12 (0xc), region = 135 }
  0xd7   : > { %s1807_s22 = smov %s1802_s20 }
  0xdb   :  { %808 = vsyncpa [#allocation3], 1 }
  0xdc   :  { %810 = vsyncpa [#allocation3 + $0x1], 1 }
  0xdd   :  { %811 = vsyncpa [#allocation6], 1 }
  0xde   :  { %813 = vsyncpa [#allocation6 + $0x1], 1 }
  0xdf   :  { %814 = vsyncpa [#allocation4], 1 }
  0xe0   :  { %816 = vsyncpa [#allocation4 + $0x1], 1 }
  0xe1   :  { %817 = vsyncpa [#allocation10], 1 }
  0xe2   :  { %819 = vsyncpa [#allocation10 + $0x1], 1 }

</bundles_post_ra>
